<compile_context>
chip_gen: v7x
topology: tpu7x:2x2x1
jax: 0.10.0
libtpu: 0.0.40
codegen_flags: <defaults>
</compile_context>

<pallas_src>
import functools

import jax
import jax.numpy as jnp
from jax.experimental import pallas as pl
from jax.experimental.pallas import tpu as pltpu

ALPHA = 0.25
GAMMA = 2.0

_SLAB = 8 * 128                    # pixels per (8, 128) f32 vreg-slab
_LOGITS_TILE_BYTES = 512 * 1024    # target per-step logits tile size (f32)


def _round_up(x, m):
    return (x + m - 1) // m * m


def _focal_loss_kernel(logits_ref, tgt_ref, out_ref, *, n_classes,
                       slabs_per_tile, pixels_per_tile, hw, alpha, gamma,
                       needs_mask):
    """One grid step: one pixel-tile of one batch element.

    logits_ref: (1, C, tile_rows, 128) logits, pixels lane-dense
    tgt_ref   : (1, tile_rows, 128)    int32 class ids
    out_ref   : (1, 8, 128)            per-lane partial sums (resident over j)
    """
    j = pl.program_id(1)

    @pl.when(j == 0)
    def _():
        out_ref[...] = jnp.zeros_like(out_ref)

    if needs_mask:
        # Hoisted: flat index of each element within one (8,128) slab.
        row_iota = jax.lax.broadcasted_iota(jnp.int32, (8, 128), 0)
        lane_iota = jax.lax.broadcasted_iota(jnp.int32, (8, 128), 1)
        slab_idx = row_iota * 128 + lane_iota
        tile_base = j * pixels_per_tile

    acc = jnp.zeros((8, 128), jnp.float32)
    for k in range(slabs_per_tile):            # unrolled: one (8,128) slab/iter
        rows = pl.ds(k * 8, 8)
        tgt = tgt_ref[0, rows, :]                                  # (8,128) i32
        xs = [logits_ref[0, c, rows, :].astype(jnp.float32)        # cast once
              for c in range(n_classes)]                           # C x (8,128)

        # Unrolled class reductions: pure VPU/EUP work, no cross-lane XLU.
        m = xs[0]
        for c in range(1, n_classes):
            m = jnp.maximum(m, xs[c])
        s = jnp.exp(xs[0] - m)
        picked = xs[0]
        for c in range(1, n_classes):
            s = s + jnp.exp(xs[c] - m)
            picked = jnp.where(tgt == c, xs[c], picked)
        # TODO(synk): out-of-range / ignore_index targets are not filtered;
        # upstream class ids must already lie in [0, C).

        ce = (m - picked) + jnp.log(s)          # per-pixel cross-entropy
        pt = jnp.exp(-ce)
        w = 1.0 - pt
        wg = w * w if gamma == 2.0 else w ** gamma   # static specialization
        focal = alpha * wg * ce

        if needs_mask:
            idx = slab_idx + (tile_base + k * _SLAB)
            focal = jnp.where(idx < hw, focal, 0.0)
        acc = acc + focal

    out_ref[0] = out_ref[0] + acc


def focal_loss_pallas(pred, target, *, alpha=ALPHA, gamma=GAMMA,
                      tile_pixels=None):
    """pred: (N, C, H, W) float; target: (N, 1, H, W) int -> scalar loss."""
    N, C, H, W = pred.shape
    hw = H * W
    total = N * hw

    if tile_pixels is None:
        # Size the tile so the per-step f32 logits slab is ~512 KiB regardless
        # of the class count (keeps double-buffered VMEM + unroll bounded).
        tile_pixels = _LOGITS_TILE_BYTES // (C * 4)

    # Tile = multiple of one (8,128) slab, clamped to the (padded) pixel count.
    tile_pixels = max(_SLAB, min(int(tile_pixels), _round_up(hw, _SLAB)))
    tile_pixels = _round_up(tile_pixels, _SLAB)
    hw_pad = _round_up(hw, tile_pixels)
    slabs_per_tile = tile_pixels // _SLAB
    tile_rows = tile_pixels // 128
    n_tiles = hw_pad // tile_pixels
    rows_pad = hw_pad // 128

    logits = pred.reshape(N, C, hw)                 # free reshape, no transpose
    tgt = target.reshape(N, hw).astype(jnp.int32)
    if hw_pad != hw:
        logits = jnp.pad(logits, ((0, 0), (0, 0), (0, hw_pad - hw)))
        tgt = jnp.pad(tgt, ((0, 0), (0, hw_pad - hw)))
    logits = logits.reshape(N, C, rows_pad, 128)
    tgt = tgt.reshape(N, rows_pad, 128)

    kernel = functools.partial(
        _focal_loss_kernel, n_classes=C, slabs_per_tile=slabs_per_tile,
        pixels_per_tile=tile_pixels, hw=hw, alpha=float(alpha),
        gamma=float(gamma), needs_mask=(hw_pad != hw))

    partials = pl.pallas_call(
        kernel,
        out_shape=jax.ShapeDtypeStruct((N, 8, 128), jnp.float32),
        grid_spec=pltpu.PrefetchScalarGridSpec(
            num_scalar_prefetch=0,
            grid=(N, n_tiles),
            in_specs=[
                pl.BlockSpec((1, C, tile_rows, 128),
                             lambda i, j: (i, 0, j, 0)),
                pl.BlockSpec((1, tile_rows, 128),
                             lambda i, j: (i, j, 0)),
            ],
            out_specs=pl.BlockSpec((1, 8, 128), lambda i, j: (i, 0, 0)),
        ),
        compiler_params=pltpu.CompilerParams(
            dimension_semantics=("parallel", "arbitrary")),
    )(logits, tgt)

    # Tiny final reduce (N*1024 floats) + mean over real pixels only.
    return jnp.sum(partials) / jnp.float32(total)


def _focal_loss_ref(pred, target, alpha=ALPHA, gamma=GAMMA):
    """Pure-JAX reference mirroring the PyTorch module."""
    N, C, H, W = pred.shape
    logits = jnp.transpose(pred, (0, 2, 3, 1)).reshape(-1, C).astype(jnp.float32)
    tgt = target.reshape(-1).astype(jnp.int32)
    lse = jax.nn.logsumexp(logits, axis=-1)
    picked = jnp.take_along_axis(logits, tgt[:, None], axis=-1)[:, 0]
    ce = lse - picked
    pt = jnp.exp(-ce)
    return jnp.mean(alpha * (1.0 - pt) ** gamma * ce)


if __name__ == "__main__":
    key = jax.random.PRNGKey(0)
    k1, k2 = jax.random.split(key)

    N, C, H, W = 2, 4, 16, 16
    pred = jax.random.normal(k1, (N, C, H, W), dtype=jnp.float32)
    target = jax.random.randint(k2, (N, 1, H, W), 0, C, dtype=jnp.int32)

    loss = focal_loss_pallas(pred, target)
    loss = jax.block_until_ready(loss)

    ref = _focal_loss_ref(pred, target)
    assert jnp.allclose(loss, ref, rtol=1e-5, atol=1e-5), (loss, ref)

    print("KERNEL_OK")
</pallas_src>

<mosaic_0001>
module attributes {stable_mosaic.version = 11 : i64} {
  func.func @_focal_loss_kernel(%arg0: i32, %arg1: i32, %arg2: memref<1x4x8x128xf32, #tpu.memory_space<vmem>>, %arg3: memref<1x8x128xi32, #tpu.memory_space<vmem>>, %arg4: memref<1x8x128xf32, #tpu.memory_space<vmem>>) attributes {dimension_semantics = [#tpu.dimension_semantics<parallel>, #tpu.dimension_semantics<arbitrary>], iteration_bounds = array<i64: 2, 1>, scalar_prefetch = 0 : i64, scratch_operands = 0 : i64, tpu.core_type = #tpu.core_type<tc>, window_params = [{transform_indices = @transform_0, window_bounds = array<i64: 1, 4, 8, 128>}, {transform_indices = @transform_1, window_bounds = array<i64: 1, 8, 128>}, {transform_indices = @transform_2, window_bounds = array<i64: 1, 8, 128>}]} {
    %c0_i32 = arith.constant 0 : i32
    %0 = arith.cmpi eq, %arg1, %c0_i32 : i32
    %1 = arith.extui %0 : i1 to i32
    %c0_i32_0 = arith.constant 0 : i32
    %2 = arith.cmpi ne, %1, %c0_i32_0 : i32
    scf.if %2 {
      %cst_27 = arith.constant 0.000000e+00 : f32
      %69 = vector.broadcast %cst_27 : f32 to vector<1x8x128xf32>
      %c0_28 = arith.constant 0 : index
      %c0_29 = arith.constant 0 : index
      %c0_30 = arith.constant 0 : index
      %70 = vector.load %arg4[%c0_28, %c0_29, %c0_30] : memref<1x8x128xf32, #tpu.memory_space<vmem>>, vector<1x8x128xf32>
      tpu.vector_store %arg4[%c0_28, %c0_29, %c0_30], %69 {strides = array<i32>} : memref<1x8x128xf32, #tpu.memory_space<vmem>>, vector<1x8x128xf32>,
    } else {
    }
    %3 = tpu.iota {dimensions = array<i32: 0>} : vector<8x128xi32>
    %4 = tpu.iota {dimensions = array<i32: 1>} : vector<8x128xi32>
    %c128_i32 = arith.constant 128 : i32
    %5 = vector.broadcast %c128_i32 : i32 to vector<8x128xi32>
    %6 = arith.muli %3, %5 : vector<8x128xi32>
    %7 = arith.addi %6, %4 : vector<8x128xi32>
    %c1024_i32 = arith.constant 1024 : i32
    %8 = arith.muli %arg1, %c1024_i32 : i32
    %cst = arith.constant 0.000000e+00 : f32
    %9 = vector.broadcast %cst : f32 to vector<8x128xf32>
    %c0 = arith.constant 0 : index
    %c0_1 = arith.constant 0 : index
    %c0_2 = arith.constant 0 : index
    %10 = vector.load %arg3[%c0, %c0_1, %c0_2] : memref<1x8x128xi32, #tpu.memory_space<vmem>>, vector<1x8x128xi32>
    %11 = vector.shape_cast %10 : vector<1x8x128xi32> to vector<8x128xi32>
    %c0_3 = arith.constant 0 : index
    %c0_4 = arith.constant 0 : index
    %c0_5 = arith.constant 0 : index
    %c0_6 = arith.constant 0 : index
    %12 = vector.load %arg2[%c0_3, %c0_4, %c0_5, %c0_6] : memref<1x4x8x128xf32, #tpu.memory_space<vmem>>, vector<1x1x8x128xf32>
    %13 = vector.shape_cast %12 : vector<1x1x8x128xf32> to vector<8x128xf32>
    %c0_7 = arith.constant 0 : index
    %c1 = arith.constant 1 : index
    %c0_8 = arith.constant 0 : index
    %c0_9 = arith.constant 0 : index
    %14 = vector.load %arg2[%c0_7, %c1, %c0_8, %c0_9] : memref<1x4x8x128xf32, #tpu.memory_space<vmem>>, vector<1x1x8x128xf32>
    %15 = vector.shape_cast %14 : vector<1x1x8x128xf32> to vector<8x128xf32>
    %c0_10 = arith.constant 0 : index
    %c2 = arith.constant 2 : index
    %c0_11 = arith.constant 0 : index
    %c0_12 = arith.constant 0 : index
    %16 = vector.load %arg2[%c0_10, %c2, %c0_11, %c0_12] : memref<1x4x8x128xf32, #tpu.memory_space<vmem>>, vector<1x1x8x128xf32>
    %17 = vector.shape_cast %16 : vector<1x1x8x128xf32> to vector<8x128xf32>
    %c0_13 = arith.constant 0 : index
    %c3 = arith.constant 3 : index
    %c0_14 = arith.constant 0 : index
    %c0_15 = arith.constant 0 : index
    %18 = vector.load %arg2[%c0_13, %c3, %c0_14, %c0_15] : memref<1x4x8x128xf32, #tpu.memory_space<vmem>>, vector<1x1x8x128xf32>
    %19 = vector.shape_cast %18 : vector<1x1x8x128xf32> to vector<8x128xf32>
    %20 = arith.maximumf %13, %15 : vector<8x128xf32>
    %21 = arith.maximumf %20, %17 : vector<8x128xf32>
    %22 = arith.maximumf %21, %19 : vector<8x128xf32>
    %23 = arith.subf %13, %22 : vector<8x128xf32>
    %24 = math.exp %23 : vector<8x128xf32>
    %25 = arith.subf %15, %22 : vector<8x128xf32>
    %26 = math.exp %25 : vector<8x128xf32>
    %27 = arith.addf %24, %26 : vector<8x128xf32>
    %c1_i32 = arith.constant 1 : i32
    %28 = vector.broadcast %c1_i32 : i32 to vector<8x128xi32>
    %29 = arith.cmpi eq, %11, %28 : vector<8x128xi32>
    %30 = arith.select %29, %15, %13 : vector<8x128xi1>, vector<8x128xf32>
    %31 = arith.subf %17, %22 : vector<8x128xf32>
    %32 = math.exp %31 : vector<8x128xf32>
    %33 = arith.addf %27, %32 : vector<8x128xf32>
    %c2_i32 = arith.constant 2 : i32
    %34 = vector.broadcast %c2_i32 : i32 to vector<8x128xi32>
    %35 = arith.cmpi eq, %11, %34 : vector<8x128xi32>
    %36 = arith.select %35, %17, %30 : vector<8x128xi1>, vector<8x128xf32>
    %37 = arith.subf %19, %22 : vector<8x128xf32>
    %38 = math.exp %37 : vector<8x128xf32>
    %39 = arith.addf %33, %38 : vector<8x128xf32>
    %c3_i32 = arith.constant 3 : i32
    %40 = vector.broadcast %c3_i32 : i32 to vector<8x128xi32>
    %41 = arith.cmpi eq, %11, %40 : vector<8x128xi32>
    %42 = arith.select %41, %19, %36 : vector<8x128xi1>, vector<8x128xf32>
    %43 = arith.subf %22, %42 : vector<8x128xf32>
    %44 = math.log %39 : vector<8x128xf32>
    %45 = arith.addf %43, %44 : vector<8x128xf32>
    %cst_16 = arith.constant 0.000000e+00 : f32
    %46 = vector.broadcast %cst_16 : f32 to vector<8x128xf32>
    %47 = arith.subf %46, %45 : vector<8x128xf32>
    %48 = math.exp %47 : vector<8x128xf32>
    %cst_17 = arith.constant 1.000000e+00 : f32
    %49 = vector.broadcast %cst_17 : f32 to vector<8x128xf32>
    %50 = arith.subf %49, %48 : vector<8x128xf32>
    %51 = arith.mulf %50, %50 : vector<8x128xf32>
    %cst_18 = arith.constant 2.500000e-01 : f32
    %52 = vector.broadcast %cst_18 : f32 to vector<8x128xf32>
    %53 = arith.mulf %52, %51 : vector<8x128xf32>
    %54 = arith.mulf %53, %45 : vector<8x128xf32>
    %c0_i32_19 = arith.constant 0 : i32
    %55 = arith.addi %8, %c0_i32_19 : i32
    %56 = vector.broadcast %55 : i32 to vector<8x128xi32>
    %57 = arith.addi %7, %56 : vector<8x128xi32>
    %c256_i32 = arith.constant 256 : i32
    %58 = vector.broadcast %c256_i32 : i32 to vector<8x128xi32>
    %59 = arith.cmpi slt, %57, %58 : vector<8x128xi32>
    %cst_20 = arith.constant 0.000000e+00 : f32
    %60 = vector.broadcast %cst_20 : f32 to vector<8x128xf32>
    %61 = arith.select %59, %54, %60 : vector<8x128xi1>, vector<8x128xf32>
    %62 = arith.addf %9, %61 : vector<8x128xf32>
    %c0_21 = arith.constant 0 : index
    %c0_22 = arith.constant 0 : index
    %c0_23 = arith.constant 0 : index
    %63 = vector.load %arg4[%c0_21, %c0_22, %c0_23] : memref<1x8x128xf32, #tpu.memory_space<vmem>>, vector<1x8x128xf32>
    %64 = vector.shape_cast %63 : vector<1x8x128xf32> to vector<8x128xf32>
    %65 = arith.addf %64, %62 : vector<8x128xf32>
    %c0_24 = arith.constant 0 : index
    %c0_25 = arith.constant 0 : index
    %c0_26 = arith.constant 0 : index
    %66 = vector.load %arg4[%c0_24, %c0_25, %c0_26] : memref<1x8x128xf32, #tpu.memory_space<vmem>>, vector<1x8x128xf32>
    %67 = vector.shape_cast %66 : vector<1x8x128xf32> to vector<8x128xf32>
    %68 = vector.shape_cast %65 : vector<8x128xf32> to vector<1x8x128xf32>
    tpu.vector_store %arg4[%c0_24, %c0_25, %c0_26], %68 {strides = array<i32>} : memref<1x8x128xf32, #tpu.memory_space<vmem>>, vector<1x8x128xf32>,
    return
  }
  func.func @transform_0(%arg0: i32, %arg1: i32) -> (i32, i32, i32, i32) {
    %c0_i32 = arith.constant 0 : i32
    %c0_i32_0 = arith.constant 0 : i32
    %c0_i32_1 = arith.constant 0 : i32
    return %arg0, %c0_i32, %arg1, %c0_i32_0 : i32, i32, i32, i32
  }
  func.func @transform_1(%arg0: i32, %arg1: i32) -> (i32, i32, i32) {
    %c0_i32 = arith.constant 0 : i32
    %c0_i32_0 = arith.constant 0 : i32
    return %arg0, %arg1, %c0_i32 : i32, i32, i32
  }
  func.func @transform_2(%arg0: i32, %arg1: i32) -> (i32, i32, i32) {
    %c0_i32 = arith.constant 0 : i32
    %c0_i32_0 = arith.constant 0 : i32
    %c0_i32_1 = arith.constant 0 : i32
    return %arg0, %c0_i32, %c0_i32_0 : i32, i32, i32
  }
}

</mosaic_0001>

<bundles_post_ra>
// kernel: tpu_custom_call.1
= control target key start
LH: loop header
LB: loop body
LE: loop exit
PB: predicated region body
PF: predicated region fallthrough
CT: control target
= control target key end

     0   :  { %7 = vsyncpa [#allocation3], 0  ;;  %s888_s0 = inlined_call_operand.hbm [shape: f32[2,4,8,128], index: 0, kind: input, shape index: {}]   ;;  %s889_s1 = inlined_call_operand.hbm [shape: s32[2,8,128], index: 1, kind: input, shape index: {}]   ;;  %s890_s2 = inlined_call_operand.hbm [shape: f32[2,8,128], index: 2, kind: output, shape index: {}]  }
   0x1   :  { %9 = vsyncpa [#allocation3 + $0x1], 0 }
   0x2   :  { %10 = vsyncpa [#allocation6], 0 }
   0x3   :  { %12 = vsyncpa [#allocation6 + $0x1], 0 }
   0x4   :  { %13 = vsyncpa [#allocation4], 0 }
   0x5   :  { %15 = vsyncpa [#allocation4 + $0x1], 0  ;;  %s669_s9 = smov 0   ;;  %s671_s10 = smov 0  }
   0x6   :  { %s673_s11 = smov 0   ;;  %s675_s12 = smov 0  }
   0x7   :  { %s677_s13 = smov 0   ;;  %s679_s14 = smov 0  }
   0x8 LB: > { %s398_s15 = sadd.s32 4294967295, %s647_s14   ;;  %s399_s16 = sadd.s32 4294967294, %s647_s14   ;;  %s647_s14 = sphi %s679_s14, %s21_s14   ;;  %s643_s13 = sphi %s677_s13, %s909_s13   ;;  %s639_s12 = sphi %s675_s12, %s908_s12   ;;  %s635_s11 = sphi %s673_s11, %s907_s11   ;;  %s631_s10 = sphi %s671_s10, %s906_s10   ;;  %s627_s9 = sphi %s669_s9, %s905_s9  }
   0x9   : > { %s33_s17 = sadd.s32 1, %s643_s13  ;;  %s42_s18 = sadd.s32 1, %s635_s11 }
   0xa   : > { %p35_p0 = scmp.ge.s32.totalorder %s33_s17, 2  ;;  %p49_p1 = scmp.ne.s32.totalorder %s635_s11, %s631_s10 }
   0xb   : > { %p50_p2 = scmp.eq.s32.totalorder %s647_s14, 0  ;;  %p55_p3 = scmp.ne.s32.totalorder %s631_s10, %s627_s9 }
   0xc   : > { %s911_s17 = smov (%p35_p0, %s33_s17), 0  ;;  %p56_p5 = scmp.eq.s32.totalorder %s398_s15, 0 }
   0xd   : > { %p710_p4 = por %p50_p2, %p49_p1  ;;  %s37_s20 = ssub.s32 %s643_s13, %s911_s17 }
   0xe   : > { %p107_p6 = scmp.eq.s32.totalorder %s398_s15, 1  ;;  %p40_p7 = scmp.eq.s32.totalorder %s37_s20, 0 }
   0xf   : > { %p716_p8 = por %p56_p5, %p55_p3  ;;  %p113_p10 = scmp.eq.s32.totalorder %s399_s16, 1 }
  0x10   : > { %p720_p9 = por %p107_p6, %p49_p1  ;;  %p436_p13 = scmp.lt.s32.totalorder %s647_s14, 2 }
  0x11   : > { %s894_s21 = scalar_select %p716_p8, 1, 0 }
  0x12   : > { %s895_s22 = scalar_select %p720_p9, 1, 0 }
  0x13   : > { %s725_s23 = scalar_select %p40_p7, %s635_s11, %s42_s18  }
  0x14   : > { %p727_p11 = por %p113_p10, %p55_p3  ;;  %s734_s25 = sand.u32 1, %s635_s11  }
  0x15   : > { %s402_s26 = sshll.u32 %s734_s25, 5  ;;  %s418_s27 = sshll.u32 %s643_s13, 9 }
  0x16   : > { %s896_s24 = scalar_select %p727_p11, 1, 0 }
  0x17   : > { %s741_s30 = scalar_lea.hbm %s888_s0, %s418_s27  ;;  %s137_s3 = scalar_lea.vmem [#allocation2], %s402_s26 }
  0x18   : > { %s145_s4 = sshll.u32 %s137_s3, 4  ;;  %p747_p0 = pnand %p436_p13, %p710_p4  ;;  %s743_s4 = int_to_ptr.vmem [resolvable:$true] %s145_s4 }
  0x19   : > { %s134_s6 = scalar_lea.sflag [#allocation3], %s734_s25  ;;  %s501_s7 = scalar_lea.hbm %s741_s30, 512 }
  0x1a   : > { %p502_p2 = scmp.ne.s32.totalorder %s741_s30, %s501_s7  ;;  %p503_p3 = pneg %p747_p0 }
  0x1b   : > { %s506_s16 = scalar_lea.hbm %s888_s0, 1024  ;;  %p507_p4 = scmp.lt.u32.totalorder %s741_s30, %s888_s0 }
  0x1c   : > { %p504_p5 = pnand %p503_p3, %p502_p2  ;;  %p508_p7 = scmp.lt.u32.totalorder %s506_s16, %s501_s7 }
  0x1d   : > { %p510_p13 = scmp.lt.u32.totalorder %s501_s7, %s741_s30 }
  0x1e   : > { %p505_p6 = pneg %p504_p5  ;;  %p509_p10 = por %p508_p7, %p507_p4 }
  0x20   : > { %p511_p12 = por %p510_p13, %p509_p10 }
  0x22   : > { %p512_p1 = pnand %p511_p12, %p505_p6 }
  0x24   : > { %515 = shalt.err (!%p512_p1)
}
  0x25   : > { %s516_s20 = scalar_lea.vmem %s743_s4, 512  ;;  %s649_s26 = smov [#allocation2]  }
  0x26   : > { %p517_p2 = scmp.ne.s32.totalorder %s743_s4, %s516_s20  ;;  %s521_s27 = sshll.u32 %s649_s26, 4  ;;  %s522_s27 = int_to_ptr.vmem [resolvable:$false] %s521_s27 }
  0x27   : > { %s523_s28 = scalar_lea.vmem %s522_s27, 1024  ;;  %p524_p9 = scmp.lt.s32.totalorder %s743_s4, %s522_s27 }
  0x28   : > { %p519_p5 = pnand %p517_p2, %p503_p3  ;;  %p525_p4 = scmp.lt.s32.totalorder %s523_s28, %s516_s20 }
  0x2a   : > { %p520_p11 = pneg %p519_p5  ;;  %p526_p7 = por %p525_p4, %p524_p9 }
  0x2c   : > { %p527_p10 = pnand %p526_p7, %p520_p11 }
  0x2e   : > { %530 = shalt.err (!%p527_p10)
}
  0x2f   : > { %s650_s29 = smov 128   ;;  %s651_s3 = smov 8  }
  0x30   : > { %428 = dma.hbm_to_vmem [thread:$0]  (!%p747_p0), %s741_s30, 512, %s743_s4, %s134_s6, %s650_s29, %s650_s29, %s651_s3  }
  0x31   : > { %p172_p12 = scmp.lt.s32.totalorder %s647_s14, 3  ;;  %s405_s7 = sshll.u32 %s734_s25, 3 }
  0x32   : > { %s406_s8 = sshll.u32 %s643_s13, 7  ;;  %p898_p9 = scmp.ge.s32.totalorder %s647_s14, 1 }
  0x33   : > { %s792_s19 = scalar_lea.hbm %s889_s1, %s406_s8  ;;  %s159_s20 = scalar_lea.vmem [#allocation5], %s405_s7 }
  0x34   : > { %p785_p11 = pnand %p898_p9, %p172_p12  ;;  %s167_s26 = sshll.u32 %s159_s20, 4  ;;  %s168_s26 = int_to_ptr.vmem [resolvable:$true] %s167_s26 }
  0x35   : > { %s156_s30 = scalar_lea.sflag [#allocation6], %s734_s25  ;;  %s531_s4 = scalar_lea.hbm %s792_s19, 128 }
  0x36   : > { %s899_s15 = scalar_select %p785_p11, 1, 0 }
  0x37   : > { %p532_p1 = scmp.ne.s32.totalorder %s792_s19, %s531_s4  ;;  %s536_s28 = scalar_lea.hbm %s889_s1, 256 }
  0x38   : > { %p537_p2 = scmp.lt.u32.totalorder %s792_s19, %s889_s1  ;;  %p538_p5 = scmp.lt.u32.totalorder %s536_s28, %s531_s4 }
  0x39   : > { %p534_p6 = pnand %p532_p1, %p503_p3  ;;  %p540_p7 = scmp.lt.u32.totalorder %s531_s4, %s792_s19 }
  0x3a   : > { %p539_p4 = por %p538_p5, %p537_p2 }
  0x3b   : > { %p535_p13 = pneg %p534_p6 }
  0x3c   : > { %p541_p10 = por %p540_p7, %p539_p4 }
  0x3e   : > { %p542_p12 = pnand %p541_p10, %p535_p13 }
  0x40   : > { %545 = shalt.err (!%p542_p12)
}
  0x41   : > { %s546_s25 = scalar_lea.vmem %s168_s26, 128  ;;  %s652_s7 = smov [#allocation5]  }
  0x42   : > { %p547_p9 = scmp.ne.s32.totalorder %s168_s26, %s546_s25  ;;  %s551_s8 = sshll.u32 %s652_s7, 4  ;;  %s552_s8 = int_to_ptr.vmem [resolvable:$false] %s551_s8 }
  0x43   : > { %s553_s16 = scalar_lea.vmem %s552_s8, 256  ;;  %p554_p8 = scmp.lt.s32.totalorder %s168_s26, %s552_s8 }
  0x44   : > { %p549_p1 = pnand %p547_p9, %p503_p3  ;;  %p555_p11 = scmp.lt.s32.totalorder %s553_s16, %s546_s25 }
  0x46   : > { %p550_p6 = pneg %p549_p1  ;;  %p556_p2 = por %p555_p11, %p554_p8 }
  0x48   : > { %p557_p5 = pnand %p556_p2, %p550_p6 }
  0x4a   : > { %560 = shalt.err (!%p557_p5)
}
  0x4b   : > { %431 = dma.hbm_to_vmem [thread:$0]  (!%p747_p0), %s792_s19, 128, %s168_s26, %s156_s30  }
  0x4c   : > { %p900_p13 = scmp.ne.s32.totalorder %s899_s15, 0 }
  0x4d   : > { %s817_s18 = sand.u32 (!%p900_p13), 1, %s631_s10   ;;  %p901_p3 = scmp.ne.s32.totalorder (!%p900_p13), %s894_s21, 0 }
  0x4e   : > { %176 = sbr.rel (%p900_p13) target bundleno = 171 (0xab), region = 28  ;;  %s408_s20 = sshll.u32 (!%p900_p13), %s817_s18, 5 }
  0x4f   : > { %s179_s4 = scalar_lea.sflag (!%p900_p13), [#allocation3], %s817_s18  ;;  %s182_s6 = scalar_lea.vmem (!%p900_p13), [#allocation2], %s408_s20 }
  0x55   : > { %614 = dma.done.wait (%p901_p3), %s179_s4, 512  }
  0x56   : > { %616 = vsyncadd (%p901_p3), %s179_s4, 4294966784  ;;  %s409_s5 = sshll.u32 %s817_s18, 3  ;;  %s188_s15 = scalar_lea.sflag [#allocation6], %s817_s18 }
  0x57   : > { %s191_s19 = scalar_lea.vmem [#allocation5], %s409_s5 }
  0x58   : > { %618 = dma.done.wait (%p901_p3), %s188_s15, 128  }
  0x59   : > { %620 = vsyncadd (%p901_p3), %s188_s15, 4294967168  ;;  %v230_v0 = vld [vmem:[%s182_s6] sm:$0xff]  ;;  %v411_v1 = vld [vmem:[%s182_s6 + $0x8] sm:$0xff]  ;;  %v222_v32 = vlaneseq  ;;  %s415_s21 = sshll.u32 %s639_s12, 7  ;;  %s216_s26 = scalar_lea.vmem [#allocation7], %s409_s5 }
  0x5a   : > { %v412_v2 = vld [vmem:[%s182_s6 + $0x10] sm:$0xff]  ;;  %v237_v3 = vmax.f32 %v230_v0, %v411_v1  ;;  %v413_v4 = vld [vmem:[%s182_s6 + $0x18] sm:$0xff]  ;;  %v229_v18 = vld [vmem:[%s191_s19] sm:$0xff]  ;;  %s294_s30 = sshll.u32 %s216_s26, 4  ;;  %s839_s29 = scalar_lea.hbm %s890_s2, %s415_s21  ;;  %s841_s30 = int_to_ptr.vmem [resolvable:$true] %s294_s30 }
  0x5b   : > { %vm247_vm0 = vcmp.eq.s32.totalorder %v229_v18, 1  ;;  %vm253_vm1 = vcmp.eq.s32.totalorder %v229_v18, 2  ;;  %vm259_vm2 = vcmp.eq.s32.totalorder %v229_v18, 3  ;;  %v223_v33 = vshrl.u32 %v222_v32, 7  ;;  %s281_s3 = scalar_lea.sflag [#allocation4], %s817_s18  ;;  %s561_s25 = scalar_lea.vmem %s841_s30, 128 }
  0x5c   : > { %v238_v5 = vmax.f32 %v237_v3, %v412_v2  ;;  %v248_v23 = vsel %vm247_vm0, %v411_v1, %v230_v0  ;;  %v225_v34 = vand.u32 127, %v222_v32  ;;  %p562_p8 = scmp.ne.s32.totalorder %s841_s30, %s561_s25  ;;  %p902_p0 = scmp.ne.s32.totalorder %s895_s22, 0 }
  0x5d   : > { %v254_v24 = vsel %vm253_vm1, %v412_v2, %v248_v23  ;;  %v226_v35 = vmul.u32 128, %v223_v33  ;;  %s653_s12 = smov [#allocation7]  }
  0x5e   : > { %v239_v6 = vmax.f32 %v238_v5, %v413_v4  ;;  %v260_v25 = vsel %vm259_vm2, %v413_v4, %v254_v24  ;;  %p563_p11 = pnand %p562_p8, %p902_p0  ;;  %s565_s7 = sshll.u32 %s653_s12, 4  ;;  %s566_s7 = int_to_ptr.vmem [resolvable:$false] %s565_s7 }
  0x5f   : > { %v227_v38 = vadd.s32 %v226_v35, %v225_v34  ;;  %s567_s8 = scalar_lea.vmem %s566_s7, 256  ;;  %p568_p7 = scmp.lt.s32.totalorder %s841_s30, %s566_s7 }
  0x60   : > { %v240_v7 = vsub.f32 %v230_v0, %v239_v6  ;;  %v243_v8 = vsub.f32 %v411_v1, %v239_v6  ;;  %v249_v9 = vsub.f32 %v412_v2, %v239_v6  ;;  %v255_v10 = vsub.f32 %v413_v4, %v239_v6  ;;  %p564_p4 = pneg %p563_p11  ;;  %p569_p10 = scmp.lt.s32.totalorder %s567_s8, %s561_s25 }
  0x61   : > { %v261_v26 = vsub.f32 %v239_v6, %v260_v25  ;;  %vm274_vm3 = vcmp.lt.s32.totalorder %v227_v38, 256 }
  0x62   : > { %v241_v11 = vmul.f32 1.442695, %v240_v7  ;;  %v244_v12 = vmul.f32 1.442695, %v243_v8  ;;  %v250_v13 = vmul.f32 1.442695, %v249_v9  ;;  %p570_p12 = por %p569_p10, %p568_p7 }
  0x63   : > { %v256_v14 = vmul.f32 1.442695, %v255_v10 }
  0x64   : > { %489 = vpow2.f32 %v241_v11  ;;  %p571_p9 = pnand %p570_p12, %p564_p4 }
  0x65   : > { %491 = vpow2.f32 %v244_v12 }
  0x66   : > { %493 = vpow2.f32 %v250_v13 }
  0x67   : > { %495 = vpow2.f32 %v256_v14 }
  0x6e   : > { %v490_v15 = vpop.eup %489 }
  0x6f   : > { %v492_v16 = vpop.eup %491 }
  0x70   : > { %v494_v17 = vpop.eup %493  ;;  %v246_v19 = vadd.f32 %v492_v16, %v490_v15 }
  0x71   : > { %v496_v20 = vpop.eup %495 }
  0x72   : > { %v252_v21 = vadd.f32 %v494_v17, %v246_v19 }
  0x74   : > { %v258_v22 = vadd.f32 %v496_v20, %v252_v21 }
  0x76   : > { %497 = vlog2.f32 %v258_v22 }
  0x80   : > { %v498_v27 = vpop.eup %497 }
  0x81   : > { %v263_v28 = vmul.f32 0.6931472, %v498_v27 }
  0x83   : > { %v264_v29 = vadd.f32 %v263_v28, %v261_v26 }
  0x85   : > { %v265_v30 = vsub.f32 0.0, %v264_v29 }
  0x87   : > { %v266_v31 = vmul.f32 1.442695, %v265_v30 }
  0x89   : > { %499 = vpow2.f32 %v266_v31 }
  0x93   : > { %v500_v36 = vpop.eup %499 }
  0x94   : > { %v268_v37 = vsub.f32 1.0, %v500_v36 }
  0x96   : > { %v269_v39 = vmul.f32 %v268_v37, %v268_v37 }
  0x98   : > { %v270_v40 = vmul.f32 0.25, %v269_v39 }
  0x9a   : > { %v271_v41 = vmul.f32 %v270_v40, %v264_v29 }
  0x9c   : > { %v275_v42 = vsel %vm274_vm3, %v271_v41, 0.0 }
  0x9d   : > { %279 = vst [vmem:[%s216_s26] sm:$0xff] %v275_v42 }
  0x9e   : > { %574 = shalt.err (!%p571_p9)
}
  0x9f   : > { %s575_s16 = scalar_lea.hbm %s839_s29, 128  ;;  %s579_s4 = scalar_lea.hbm %s890_s2, 256 }
  0xa0   : > { %p576_p1 = scmp.ne.s32.totalorder %s839_s29, %s575_s16  ;;  %p580_p5 = scmp.lt.u32.totalorder %s839_s29, %s890_s2 }
  0xa1   : > { %p581_p13 = scmp.lt.u32.totalorder %s579_s4, %s575_s16  ;;  %p583_p8 = scmp.lt.u32.totalorder %s575_s16, %s839_s29 }
  0xa2   : > { %p577_p6 = pnand %p576_p1, %p902_p0 }
  0xa3   : > { %p582_p3 = por %p581_p13, %p580_p5 }
  0xa4   : > { %p578_p2 = pneg %p577_p6 }
  0xa5   : > { %p584_p11 = por %p583_p8, %p582_p3 }
  0xa7   : > { %p585_p4 = pnand %p584_p11, %p578_p2 }
  0xa9   : > { %588 = shalt.err (!%p585_p4)
}
  0xaa   : > { %423 = dma.vmem_to_hbm [thread:$0]  (%p902_p0), %s841_s30, 128, %s839_s29, %s281_s3  }
  0xab PF: > { %s306_s15 = sand.u32 1, %s627_s9   ;;  %p903_p7 = scmp.ne.s32.totalorder %s896_s24, 0 }
  0xac   : > { %p904_p10 = scmp.ge.s32.totalorder %s647_s14, 2  ;;  %s307_s19 = scalar_lea.sflag [#allocation4], %s306_s15 }
  0xae   : > { %p433_p12 = pnand %p904_p10, %p903_p7 }
  0xb0   : > { %622 = dma.done.wait (!%p433_p12), %s307_s19, 128  }
  0xb1   : > { %624 = vsyncadd (!%p433_p12), %s307_s19, 4294967168  ;;  %s21_s14 = sadd.s32 1, %s647_s14   ;;  %s905_s9 = smov %s631_s10 }
  0xb2   : > { %p18_p9 = scmp.ge.s32.totalorder %s21_s14, 4   ;;  %s906_s10 = smov %s635_s11 }
  0xb3   : > { %s907_s11 = smov %s725_s23  ;;  %s908_s12 = smov %s643_s13 }
  0xb4   : > { %s909_s13 = smov %s911_s17  ;;  %20 = sbr.rel (!%p18_p9) target bundleno = 8 (0x8), region = 93 }
  0xbb   :  { %312 = vsyncpa [#allocation3], 1 }
  0xbc   :  { %314 = vsyncpa [#allocation3 + $0x1], 1 }
  0xbd   :  { %315 = vsyncpa [#allocation6], 1 }
  0xbe   :  { %317 = vsyncpa [#allocation6 + $0x1], 1 }
  0xbf   :  { %318 = vsyncpa [#allocation4], 1 }
  0xc0   :  { %320 = vsyncpa [#allocation4 + $0x1], 1 }

</bundles_post_ra>
